<compile_context>
chip_gen: v6e
topology: v6e:2x2x1
jax: 0.10.0
libtpu: 0.0.40
codegen_flags: <defaults>
</compile_context>

<pallas_src>
import functools
import math

import jax
import jax.numpy as jnp
from jax import lax
from jax.experimental import pallas as pl
from jax.experimental.pallas import tpu as pltpu


# ----------------------------------------------------------------------------
# Kernel: one (TR, TL) tile of the (rows, H2*W) slab.  Lane tiles are always
# W-aligned, so the only lane whose "next pixel" lives outside its own image
# row is the padded w == W-1 column, which is zeroed by the in-kernel mask.
# ----------------------------------------------------------------------------
def _edge_kernel(x_ref, o_ref, *, w):
    x = x_ref[...].astype(jnp.float32)               # in-register upcast (free vs HBM)
    tl = x.shape[-1]
    if tl % 128 == 0:
        # nxt[:, i] = x[:, (i + 1) % tl] -- single XLU lane rotation
        # (vector-extended slot, free relative to the load/store slots).
        nxt = pltpu.roll(x, shift=tl - 1, axis=1)
    else:
        # Tiny / non-128-aligned lane tiles: build the shift from static slices.
        nxt = jnp.concatenate([x[:, 1:], x[:, :1]], axis=-1)
    edge = jnp.maximum(x - nxt, 0.0)                 # ReLU(m[w] - m[w+1])
    # Padded-column mask built in-register: lane tiles are W-aligned, so the
    # local lane index mod W equals the image column index.
    lane = lax.broadcasted_iota(jnp.int32, edge.shape, 1)
    keep = (lane % w) != (w - 1)
    o_ref[...] = jnp.where(keep, edge, 0.0).astype(o_ref.dtype)


# ----------------------------------------------------------------------------
# Tiling helpers
# ----------------------------------------------------------------------------
def _divisors(n):
    ds = set()
    i = 1
    while i * i <= n:
        if n % i == 0:
            ds.add(i)
            ds.add(n // i)
        i += 1
    return sorted(ds)


def _choose_tiles(n_rows, n_lanes, w, itemsize, sub,
                  block_budget_bytes=1 << 20, target_steps=4):
    """Pick a legal (row_tile, lane_tile) block for the (n_rows, n_lanes) slab.

    Legality: row tile is a multiple of the sublane pack (`sub`) or == n_rows;
    lane tile is a multiple of lcm(W, 128) (W-aligned AND lane-dense) or
    == n_lanes.  Preference order: fits ~1 MiB/block, gives the grid at least
    `target_steps` steps (v7x megacore), then the largest (fewest-step),
    lane-densest block.
    """
    lane_step = (w * 128) // math.gcd(w, 128)        # lcm(W, 128)
    lane_tiles = {d for d in _divisors(n_lanes) if d % lane_step == 0}
    lane_tiles.add(n_lanes)                          # full dim always legal
    row_tiles = {d for d in _divisors(n_rows) if d % sub == 0}
    row_tiles.add(n_rows)

    budget_item = max(itemsize, 4)                   # f32 compute working set

    def score(tr_tl):
        tr, tl = tr_tl
        blk = tr * tl * budget_item
        steps = (n_rows // tr) * (n_lanes // tl)
        fits = blk <= block_budget_bytes
        # If nothing fits the budget, prefer the smallest block instead.
        return (fits, min(steps, target_steps), blk if fits else -blk, tl)

    return max(((tr, tl) for tr in row_tiles for tl in lane_tiles), key=score)


# ----------------------------------------------------------------------------
# Wrapper
# ----------------------------------------------------------------------------
def net_edge_horizontal2_forward(mask):
    """mask: (N, C, H, W) float array (C == 1 for this module) -> same shape/dtype."""
    N, C, H, W = mask.shape
    dtype = mask.dtype
    itemsize = jnp.dtype(dtype).itemsize
    sub = max(8, 32 // max(itemsize, 1))             # sublane pack: 8 f32 / 16 bf16 / 32 i8

    # Fold part of H into the row dim when N*C alone is not sublane-aligned,
    # preferring folds that keep the lane dim >= 128.  Lanes stay W-aligned.
    R0 = N * C
    h1 = 1
    if R0 % sub != 0:
        cands = [d for d in _divisors(H) if (R0 * d) % sub == 0]
        if cands:
            wide = [d for d in cands if (H // d) * W >= 128]
            h1 = min(wide) if wide else min(cands)
    R = R0 * h1
    L = (H // h1) * W

    x2d = mask.reshape(R, L)                         # pure view, no transpose / copy

    TR, TL = _choose_tiles(R, L, W, itemsize, sub)
    grid = (R // TR, L // TL)

    params = {"dimension_semantics": ("parallel", "parallel")}
    vmem_bytes = 2 * 2 * TR * TL * itemsize          # (in + out) x double-buffer
    if vmem_bytes > (12 << 20):                      # only the no-small-tile fallback
        params["vmem_limit_bytes"] = int(min(vmem_bytes + (8 << 20), 127 << 20))

    out2d = pl.pallas_call(
        functools.partial(_edge_kernel, w=W),
        out_shape=jax.ShapeDtypeStruct((R, L), dtype),
        grid=grid,
        in_specs=[pl.BlockSpec((TR, TL), lambda r, c: (r, c))],
        out_specs=pl.BlockSpec((TR, TL), lambda r, c: (r, c)),
        compiler_params=pltpu.CompilerParams(**params),
        cost_estimate=pl.CostEstimate(
            flops=2 * R * L,
            bytes_accessed=2 * R * L * itemsize,
            transcendentals=0),
    )(x2d)

    return out2d.reshape(N, C, H, W)


# ----------------------------------------------------------------------------
# Pure-JAX reference (mirrors the PyTorch module) for the correctness check.
# ----------------------------------------------------------------------------
def _ref_forward(mask):
    diff = mask[..., :-1] - mask[..., 1:]                     # conv (1,2) w=[1,-1]
    diff = jnp.pad(diff, ((0, 0), (0, 0), (0, 0), (0, 1)))    # ZeroPad2d((0,1,0,0))
    return jnp.maximum(diff, 0.0)                             # ReLU


if __name__ == "__main__":
    key = jax.random.PRNGKey(0)
    k1, k2 = jax.random.split(key)

    # Canonical small config for the module: batch 2, single-channel 16x16 mask.
    mask = jax.random.normal(k1, (2, 1, 16, 16), jnp.float32)
    out = jax.block_until_ready(net_edge_horizontal2_forward(mask))
    ref = _ref_forward(mask)
    assert out.shape == mask.shape, out.shape
    assert out.dtype == mask.dtype
    assert jnp.allclose(out, ref, atol=1e-6, rtol=1e-6), float(
        jnp.max(jnp.abs(out - ref)))
    assert jnp.all(out[..., -1] == 0.0)

    # Larger bf16 config: exercises the native-dtype path, the XLU lane-rotate
    # shift, and a multi-step (megacore-friendly) grid.
    mask2 = jax.random.normal(k2, (2, 1, 64, 128), jnp.float32).astype(jnp.bfloat16)
    out2 = jax.block_until_ready(net_edge_horizontal2_forward(mask2))
    ref2 = _ref_forward(mask2.astype(jnp.float32))
    assert out2.shape == mask2.shape and out2.dtype == jnp.bfloat16
    assert jnp.allclose(out2.astype(jnp.float32), ref2, atol=2e-2, rtol=2e-2), float(
        jnp.max(jnp.abs(out2.astype(jnp.float32) - ref2)))
    assert jnp.all(out2[..., -1] == 0)

    print("KERNEL_OK")
</pallas_src>

<mosaic_0001>
module attributes {stable_mosaic.version = 11 : i64} {
  func.func @_edge_kernel(%arg0: i32, %arg1: i32, %arg2: memref<8x64xf32, #tpu.memory_space<vmem>>, %arg3: memref<8x64xf32, #tpu.memory_space<vmem>>) attributes {dimension_semantics = [#tpu.dimension_semantics<parallel>, #tpu.dimension_semantics<parallel>], iteration_bounds = array<i64: 1, 1>, scalar_prefetch = 0 : i64, scratch_operands = 0 : i64, tpu.core_type = #tpu.core_type<tc>, window_params = [{transform_indices = @transform_0, window_bounds = array<i64: 8, 64>}, {transform_indices = @transform_1, window_bounds = array<i64: 8, 64>}]} {
    %c0 = arith.constant 0 : index
    %c0_0 = arith.constant 0 : index
    %0 = vector.load %arg2[%c0, %c0_0] : memref<8x64xf32, #tpu.memory_space<vmem>>, vector<8x64xf32>
    %1 = vector.extract_strided_slice %0 {offsets = [0, 1], sizes = [8, 63], strides = [1, 1]} : vector<8x64xf32> to vector<8x63xf32>
    %2 = vector.extract_strided_slice %0 {offsets = [0, 0], sizes = [8, 1], strides = [1, 1]} : vector<8x64xf32> to vector<8x1xf32>
    %3 = tpu.concatenate %1, %2 in 1 : vector<8x63xf32>, vector<8x1xf32> -> vector<8x64xf32>
    %4 = arith.subf %0, %3 : vector<8x64xf32>
    %cst = arith.constant 0.000000e+00 : f32
    %5 = vector.broadcast %cst : f32 to vector<8x64xf32>
    %6 = arith.maximumf %4, %5 : vector<8x64xf32>
    %7 = tpu.iota {dimensions = array<i32: 1>} : vector<8x64xi32>
    %c16_i32 = arith.constant 16 : i32
    %c0_i32 = arith.constant 0 : i32
    %8 = arith.cmpi eq, %c16_i32, %c0_i32 : i32
    %c1_i32 = arith.constant 1 : i32
    %9 = arith.select %8, %c1_i32, %c16_i32 : i32
    %10 = vector.broadcast %9 : i32 to vector<8x64xi32>
    %11 = arith.remsi %7, %10 : vector<8x64xi32>
    %c0_i32_1 = arith.constant 0 : i32
    %12 = vector.broadcast %c0_i32_1 : i32 to vector<8x64xi32>
    %13 = arith.cmpi ne, %11, %12 : vector<8x64xi32>
    %c0_i32_2 = arith.constant 0 : i32
    %14 = vector.broadcast %c0_i32_2 : i32 to vector<8x64xi32>
    %15 = arith.cmpi slt, %11, %14 : vector<8x64xi32>
    %c0_i32_3 = arith.constant 0 : i32
    %16 = arith.cmpi slt, %9, %c0_i32_3 : i32
    %17 = vector.broadcast %16 : i1 to vector<8x64xi1>
    %18 = vector.broadcast %17 : vector<8x64xi1> to vector<8x64xi1>
    %19 = arith.xori %15, %18 : vector<8x64xi1>
    %20 = arith.andi %19, %13 : vector<8x64xi1>
    %21 = vector.broadcast %9 : i32 to vector<8x64xi32>
    %22 = arith.addi %11, %21 : vector<8x64xi32>
    %23 = arith.select %20, %22, %11 : vector<8x64xi1>, vector<8x64xi32>
    %c15_i32 = arith.constant 15 : i32
    %24 = vector.broadcast %c15_i32 : i32 to vector<8x64xi32>
    %25 = arith.cmpi ne, %23, %24 : vector<8x64xi32>
    %cst_4 = arith.constant 0.000000e+00 : f32
    %26 = vector.broadcast %cst_4 : f32 to vector<8x64xf32>
    %27 = arith.select %25, %6, %26 : vector<8x64xi1>, vector<8x64xf32>
    %c0_5 = arith.constant 0 : index
    %c0_6 = arith.constant 0 : index
    %28 = vector.load %arg3[%c0_5, %c0_6] : memref<8x64xf32, #tpu.memory_space<vmem>>, vector<8x64xf32>
    tpu.vector_store %arg3[%c0_5, %c0_6], %27 {strides = array<i32>} : memref<8x64xf32, #tpu.memory_space<vmem>>, vector<8x64xf32>,
    return
  }
  func.func @transform_0(%arg0: i32, %arg1: i32) -> (i32, i32) {
    %c0_i32 = arith.constant 0 : i32
    return %arg0, %arg1 : i32, i32
  }
  func.func @transform_1(%arg0: i32, %arg1: i32) -> (i32, i32) {
    %c0_i32 = arith.constant 0 : i32
    return %arg0, %arg1 : i32, i32
  }
}

</mosaic_0001>

<bundles_post_ra>
// kernel: tpu_custom_call.1
= control target key start
LH: loop header
LB: loop body
LE: loop exit
PB: predicated region body
PF: predicated region fallthrough
CT: control target
= control target key end

     0   :  { %6 = vsyncpa [#allocation3], 0  ;;  %s134_s0 = inlined_call_operand.hbm [shape: f32[8,64], index: 0, kind: input, shape index: {}]   ;;  %s135_s1 = inlined_call_operand.hbm [shape: f32[8,64], index: 1, kind: output, shape index: {}]  }
   0x1   :  { %7 = vsyncpa [#allocation4], 0  ;;  %s114_s6 = smov [#allocation2]  }
   0x2   :  { %s14_s7 = sshll.u32 %s114_s6, 4  ;;  %s15_s7 = int_to_ptr.vmem [resolvable:$true] %s14_s7 }
   0x3   :  { %s78_s8 = scalar_lea.vmem %s15_s7, 128  ;;  %p83_p1 = scmp.lt.s32.totalorder %s15_s7, %s15_s7 }
   0x4   :  { %p79_p0 = scmp.ne.s32.totalorder %s15_s7, %s78_s8  ;;  %p84_p2 = scmp.lt.s32.totalorder %s78_s8, %s78_s8 }
   0x6   :  { %p85_p3 = por %p84_p2, %p83_p1 }
   0x8   :  { %p86_p4 = pnand %p85_p3, %p79_p0 }
   0xa   :  { %89 = shalt.err (!%p86_p4)
}
   0xb   :  { %17 = dma.hbm_to_vmem [thread:$0]  %s134_s0, 128, %s15_s7, [#allocation3]  }
   0xc   :  { %110 = dma.done.wait [#allocation3], 128  }
   0xd   :  { %111 = vsyncadd [#allocation3], 4294967168  ;;  %v21_v0 = vld [vmem:[#allocation2] sm:$0xff]  ;;  %s115_s11 = smov 127   ;;  %s116_s12 = smov 63   ;;  %v33_v1 = vlaneseq  ;;  %vm29_vm0 = vcmask 515072  }
   0xe   :  { %23 = vrot.lane.b32.xlu0 %v21_v0, %s115_s11  ;;  %s117_s13 = smov [#allocation5]   ;;  %vm49_vm2 = vcmask 523264  }
   0xf   :  { %v34_v2 = vand.u32 127, %v33_v1  ;;  %s57_s14 = sshll.u32 %s117_s13, 4  ;;  %s58_s14 = int_to_ptr.vmem [resolvable:$true] %s57_s14 }
  0x10   :  { %s90_s0 = scalar_lea.vmem %s58_s14, 128  ;;  %p95_p6 = scmp.lt.s32.totalorder %s58_s14, %s58_s14 }
  0x11   :  { %v39_v4 = vand.u32 15, %v34_v2  ;;  %p91_p5 = scmp.ne.s32.totalorder %s58_s14, %s90_s0  ;;  %p96_p7 = scmp.lt.s32.totalorder %s90_s0, %s90_s0 }
  0x12   :  { %26 = vrot.lane.b32.xlu0 %v21_v0, %s116_s12 }
  0x13   :  { %vm47_vm1 = vcmp.ne.s32.totalorder %v39_v4, 15  ;;  %p97_p8 = por %p96_p7, %p95_p6 }
  0x15   :  { %p98_p9 = pnand %p97_p8, %p91_p5 }
  0x80   :  { %v24_v3 = vpop.permute.xlu0 %23 }
  0x84   :  { %v27_v5 = vpop.permute.xlu0 %26 }
  0x85   :  { %v30_v6 = vsel %vm29_vm0, %v24_v3, %v27_v5 }
  0x86   :  { %v31_v7 = vsub.f32 %v21_v0, %v30_v6 }
  0x88   :  { %v32_v8 = vmax.f32 %v31_v7, 0.0 }
  0x8a   :  { %v48_v9 = vsel %vm47_vm1, %v32_v8, 0.0 }
  0x8b   :  { %50 = vst.msk [vmem:[#allocation5] sm:$0xff] %vm49_vm2, %v48_v9 }
  0x8c   :  { %101 = shalt.err (!%p98_p9)
}
  0x8d   :  { %60 = dma.vmem_to_hbm [thread:$0]  %s58_s14, 128, %s135_s1, [#allocation4]  }
  0x8e   :  { %112 = dma.done.wait [#allocation4], 128  }
  0x8f   :  { %113 = vsyncadd [#allocation4], 4294967168 }
  0x90   :  { %64 = vsyncpa [#allocation3], 1 }
  0x91   :  { %65 = vsyncpa [#allocation4], 1 }

</bundles_post_ra>
